<compile_context>
chip_gen: v6e
topology: v6e:2x2x1
jax: 0.10.0
libtpu: 0.0.40
codegen_flags: <defaults>
</compile_context>

<pallas_src>
import jax
import jax.numpy as jnp
from jax.experimental import pallas as pl
from jax.experimental.pallas import tpu as pltpu


def _mlm_kernel(f_ref, g_ref, o_ref):
    """out[b, c*F + k] = g[b, c] * f[b, k], stored as one lane-dense slab.

    f_ref: (Bt, F), g_ref: (Bt, C), o_ref: (Bt, C*F)
    """
    Cdim = g_ref.shape[1]
    # Unrolled over the small, static channel count.  f is reloaded from VMEM
    # per channel (cheap) so the full (Bt, F) value is never pinned live across
    # all C uses.  A single full-width store keeps the store path unmasked.
    chunks = [
        (g_ref[:, c:c + 1] * f_ref[...]).astype(o_ref.dtype)
        for c in range(Cdim)
    ]
    o_ref[...] = jnp.concatenate(chunks, axis=1) if Cdim > 1 else chunks[0]


def _device_kind() -> str:
    try:
        return jax.devices()[0].device_kind.lower()
    except Exception:
        return ""


def _vmem_capacity_bytes() -> int:
    """Physical per-core VMEM capacity; conservative fallback if unqueryable."""
    try:
        cap = getattr(pltpu.get_tpu_info(), "vmem_capacity_bytes", None)
        if cap:
            return int(cap)
    except Exception:
        pass
    if "v7" in _device_kind():
        return 64 << 20
    return 128 << 20


def _round_down(x: int, m: int) -> int:
    return (x // m) * m


def _choose_batch_tile(B, C, F, itemsize, target_bytes, sublane, min_steps=4):
    """Largest sublane-aligned batch tile within the byte target that still
    leaves a multi-step grid when B is big enough."""
    row_bytes = max(1, C * F * itemsize)
    rows = max(1, target_bytes // row_bytes)
    # Never collapse the grid to one step when B allows multiple blocks:
    # keeps the DMA/compute pipeline primed and lets multi-TC chips shard it.
    rows = min(rows, max(1, -(-B // min_steps)))
    if rows >= B:
        return B                              # full extent: always legal
    rows = max(sublane, _round_down(rows, sublane))
    return B if rows >= B else rows


def multi_linear_map(f: jax.Array, g: jax.Array) -> jax.Array:
    """Pallas implementation of MultiLinearMap.forward.

    f: (B, F), g: (B, C) -> (B, C * F), dtype = promoted input dtype.
    """
    assert f.ndim == 2 and g.ndim == 2 and f.shape[0] == g.shape[0]
    B, Fdim = f.shape
    _, Cdim = g.shape
    out_dtype = jnp.result_type(f.dtype, g.dtype)
    out_item = jnp.dtype(out_dtype).itemsize
    f_item = jnp.dtype(f.dtype).itemsize
    g_item = jnp.dtype(g.dtype).itemsize

    vmem_cap = _vmem_capacity_bytes()
    # Generation-aware output-tile target: bigger tiles amortize the ~0.35 us
    # per-grid-step overhead; ~16 MiB on 128 MiB parts, ~8 MiB on v7x.
    target_tile_bytes = vmem_cap // 8
    # Sublane multiple native to the output dtype (8 f32 / 16 bf16 / 32 int8).
    sublane = 8 * max(1, 4 // out_item)

    Bt = _choose_batch_tile(B, Cdim, Fdim, out_item, target_tile_bytes, sublane)
    grid = (pl.cdiv(B, Bt),)

    # Scoped-VMEM limit from the actual double-buffered working set plus a
    # margin for compiler-internal scratch, capped at ~3/4 of physical VMEM so
    # we never request the whole chip (unsafe on v7x's 64 MiB).
    working = 2 * Bt * (Cdim * Fdim * out_item + Fdim * f_item + Cdim * g_item)
    vmem_limit = min(max(working + (8 << 20), 32 << 20), (vmem_cap * 3) // 4)

    # Shard the batch axis across TensorCores on multi-TC chips (v7x) when the
    # grid actually has multiple steps; plain "parallel" elsewhere.
    if "v7" in _device_kind() and grid[0] >= 2:
        semantics = (pltpu.CORE_PARALLEL,)
    else:
        semantics = ("parallel",)

    cost = pl.CostEstimate(
        flops=B * Cdim * Fdim,
        transcendentals=0,
        bytes_accessed=(B * Fdim * f_item + B * Cdim * g_item
                        + B * Cdim * Fdim * out_item),
    )

    return pl.pallas_call(
        _mlm_kernel,
        out_shape=jax.ShapeDtypeStruct((B, Cdim * Fdim), out_dtype),
        grid=grid,
        in_specs=[
            pl.BlockSpec((Bt, Fdim), lambda i: (i, 0)),
            pl.BlockSpec((Bt, Cdim), lambda i: (i, 0)),
        ],
        out_specs=pl.BlockSpec((Bt, Cdim * Fdim), lambda i: (i, 0)),
        compiler_params=pltpu.CompilerParams(
            dimension_semantics=semantics,
            vmem_limit_bytes=vmem_limit,
        ),
        cost_estimate=cost,
    )(f, g)


def _reference(f, g):
    # Pure-JAX reference matching torch.bmm(g.unsqueeze(2), f.unsqueeze(1)).view(B, -1)
    return (g[:, :, None].astype(jnp.float32)
            * f[:, None, :].astype(jnp.float32)).reshape(f.shape[0], -1)


if __name__ == "__main__":
    key = jax.random.PRNGKey(0)
    kf, kg, kf2, kg2, kf3, kg3 = jax.random.split(key, 6)

    # Case 1: shapes implied by the module: f=(B, F), g=(B, C) -> out=(B, C*F).
    B, Fdim, Cdim = 2, 32, 4
    f = jax.random.normal(kf, (B, Fdim), dtype=jnp.float32)
    g = jax.random.normal(kg, (B, Cdim), dtype=jnp.float32)
    out = jax.block_until_ready(multi_linear_map(f, g))
    assert out.shape == (B, Cdim * Fdim), out.shape
    assert jnp.allclose(out, _reference(f, g), atol=1e-6, rtol=1e-6)

    # Case 2: multi-step grid with a partial final batch block, F % 128 != 0.
    B2, F2, C2 = 50, 96, 3
    f2 = jax.random.normal(kf2, (B2, F2), dtype=jnp.float32)
    g2 = jax.random.normal(kg2, (B2, C2), dtype=jnp.float32)
    out2 = jax.block_until_ready(multi_linear_map(f2, g2))
    assert out2.shape == (B2, C2 * F2), out2.shape
    assert jnp.allclose(out2, _reference(f2, g2), atol=1e-6, rtol=1e-6)

    # Case 3: bf16 inputs (exercises packed-dtype sublane alignment + cast path).
    B3, F3, C3 = 8, 64, 4
    f3 = jax.random.normal(kf3, (B3, F3), dtype=jnp.bfloat16)
    g3 = jax.random.normal(kg3, (B3, C3), dtype=jnp.bfloat16)
    out3 = jax.block_until_ready(multi_linear_map(f3, g3))
    assert out3.shape == (B3, C3 * F3), out3.shape
    assert jnp.allclose(out3.astype(jnp.float32), _reference(f3, g3),
                        atol=2e-2, rtol=2e-2)

    print("KERNEL_OK")
</pallas_src>

<mosaic_0001>
module attributes {stable_mosaic.version = 11 : i64} {
  func.func @_mlm_kernel(%arg0: i32, %arg1: memref<2x32xf32, #tpu.memory_space<vmem>>, %arg2: memref<2x4xf32, #tpu.memory_space<vmem>>, %arg3: memref<2x128xf32, #tpu.memory_space<vmem>>) attributes {dimension_semantics = [#tpu.dimension_semantics<parallel>], iteration_bounds = array<i64: 1>, scalar_prefetch = 0 : i64, scratch_operands = 0 : i64, tpu.core_type = #tpu.core_type<tc>, window_params = [{transform_indices = @transform_0, window_bounds = array<i64: 2, 32>}, {transform_indices = @transform_1, window_bounds = array<i64: 2, 4>}, {transform_indices = @transform_2, window_bounds = array<i64: 2, 128>}]} {
    %c0 = arith.constant 0 : index
    %c0_0 = arith.constant 0 : index
    %0 = vector.load %arg2[%c0, %c0_0] : memref<2x4xf32, #tpu.memory_space<vmem>>, vector<2x1xf32>
    %c0_1 = arith.constant 0 : index
    %c0_2 = arith.constant 0 : index
    %1 = vector.load %arg1[%c0_1, %c0_2] : memref<2x32xf32, #tpu.memory_space<vmem>>, vector<2x32xf32>
    %2 = vector.broadcast %0 : vector<2x1xf32> to vector<2x32xf32>
    %3 = arith.mulf %2, %1 : vector<2x32xf32>
    %c0_3 = arith.constant 0 : index
    %c1 = arith.constant 1 : index
    %4 = vector.load %arg2[%c0_3, %c1] : memref<2x4xf32, #tpu.memory_space<vmem>>, vector<2x1xf32>
    %c0_4 = arith.constant 0 : index
    %c0_5 = arith.constant 0 : index
    %5 = vector.load %arg1[%c0_4, %c0_5] : memref<2x32xf32, #tpu.memory_space<vmem>>, vector<2x32xf32>
    %6 = vector.broadcast %4 : vector<2x1xf32> to vector<2x32xf32>
    %7 = arith.mulf %6, %5 : vector<2x32xf32>
    %c0_6 = arith.constant 0 : index
    %c2 = arith.constant 2 : index
    %8 = vector.load %arg2[%c0_6, %c2] : memref<2x4xf32, #tpu.memory_space<vmem>>, vector<2x1xf32>
    %c0_7 = arith.constant 0 : index
    %c0_8 = arith.constant 0 : index
    %9 = vector.load %arg1[%c0_7, %c0_8] : memref<2x32xf32, #tpu.memory_space<vmem>>, vector<2x32xf32>
    %10 = vector.broadcast %8 : vector<2x1xf32> to vector<2x32xf32>
    %11 = arith.mulf %10, %9 : vector<2x32xf32>
    %c0_9 = arith.constant 0 : index
    %c3 = arith.constant 3 : index
    %12 = vector.load %arg2[%c0_9, %c3] : memref<2x4xf32, #tpu.memory_space<vmem>>, vector<2x1xf32>
    %c0_10 = arith.constant 0 : index
    %c0_11 = arith.constant 0 : index
    %13 = vector.load %arg1[%c0_10, %c0_11] : memref<2x32xf32, #tpu.memory_space<vmem>>, vector<2x32xf32>
    %14 = vector.broadcast %12 : vector<2x1xf32> to vector<2x32xf32>
    %15 = arith.mulf %14, %13 : vector<2x32xf32>
    %16 = tpu.concatenate %3, %7, %11, %15 in 1 : vector<2x32xf32>, vector<2x32xf32>, vector<2x32xf32>, vector<2x32xf32> -> vector<2x128xf32>
    %c0_12 = arith.constant 0 : index
    %c0_13 = arith.constant 0 : index
    %17 = vector.load %arg3[%c0_12, %c0_13] : memref<2x128xf32, #tpu.memory_space<vmem>>, vector<2x128xf32>
    tpu.vector_store %arg3[%c0_12, %c0_13], %16 {strides = array<i32>} : memref<2x128xf32, #tpu.memory_space<vmem>>, vector<2x128xf32>,
    return
  }
  func.func @transform_0(%arg0: i32) -> (i32, i32) {
    %c0_i32 = arith.constant 0 : i32
    %c0_i32_0 = arith.constant 0 : i32
    return %arg0, %c0_i32 : i32, i32
  }
  func.func @transform_1(%arg0: i32) -> (i32, i32) {
    %c0_i32 = arith.constant 0 : i32
    %c0_i32_0 = arith.constant 0 : i32
    return %arg0, %c0_i32 : i32, i32
  }
  func.func @transform_2(%arg0: i32) -> (i32, i32) {
    %c0_i32 = arith.constant 0 : i32
    %c0_i32_0 = arith.constant 0 : i32
    return %arg0, %c0_i32 : i32, i32
  }
}

</mosaic_0001>

<bundles_post_ra>
// kernel: tpu_custom_call.1
= control target key start
LH: loop header
LB: loop body
LE: loop exit
PB: predicated region body
PF: predicated region fallthrough
CT: control target
= control target key end

     0   :  { %7 = vsyncpa [#allocation3], 0  ;;  %s209_s0 = inlined_call_operand.hbm [shape: f32[2,32], index: 0, kind: input, shape index: {}]   ;;  %s210_s1 = inlined_call_operand.hbm [shape: f32[2,4], index: 1, kind: input, shape index: {}]   ;;  %s211_s2 = inlined_call_operand.hbm [shape: f32[2,128], index: 2, kind: output, shape index: {}]  }
   0x1   :  { %8 = vsyncpa [#allocation6], 0 }
   0x2   :  { %9 = vsyncpa [#allocation4], 0  ;;  %s175_s9 = smov [#allocation2]   ;;  %s176_s11 = smov [#allocation5]  }
   0x3   :  { %s16_s10 = sshll.u32 %s175_s9, 4  ;;  %s26_s12 = sshll.u32 %s176_s11, 4  ;;  %s17_s10 = int_to_ptr.vmem [resolvable:$true] %s16_s10  ;;  %s27_s12 = int_to_ptr.vmem [resolvable:$true] %s26_s12 }
   0x4   :  { %s117_s13 = scalar_lea.vmem %s17_s10, 32  ;;  %p122_p1 = scmp.lt.s32.totalorder %s17_s10, %s17_s10 }
   0x5   :  { %p118_p0 = scmp.ne.s32.totalorder %s17_s10, %s117_s13  ;;  %p123_p2 = scmp.lt.s32.totalorder %s117_s13, %s117_s13 }
   0x7   :  { %p124_p3 = por %p123_p2, %p122_p1 }
   0x9   :  { %p125_p4 = pnand %p124_p3, %p118_p0 }
   0xb   :  { %128 = shalt.err (!%p125_p4)
}
   0xc   :  { %19 = dma.hbm_to_vmem [thread:$0]  %s209_s0, 32, %s17_s10, [#allocation3]  }
   0xd   :  { %s137_s16 = scalar_lea.vmem %s27_s12, 32  ;;  %p142_p6 = scmp.lt.s32.totalorder %s27_s12, %s27_s12 }
   0xe   :  { %p138_p5 = scmp.ne.s32.totalorder %s27_s12, %s137_s16  ;;  %p143_p7 = scmp.lt.s32.totalorder %s137_s16, %s137_s16 }
  0x10   :  { %p144_p8 = por %p143_p7, %p142_p6 }
  0x12   :  { %p145_p9 = pnand %p144_p8, %p138_p5 }
  0x14   :  { %148 = shalt.err (!%p145_p9)
}
  0x15   :  { %29 = dma.hbm_to_vmem [thread:$0]  %s210_s1, 32, %s27_s12, [#allocation6]  }
  0x16   :  { %169 = dma.done.wait [#allocation3], 32  }
  0x17   :  { %170 = vsyncadd [#allocation3], 4294967264 }
  0x18   :  { %171 = dma.done.wait [#allocation6], 32  }
  0x19   :  { %172 = vsyncadd [#allocation6], 4294967264  ;;  %v177_v0 = vmov 1   ;;  %v178_v1 = vmov 3   ;;  %v36_v2 = vld [vmem:[#allocation5] sm:$0x3] }
  0x1a   :  { %104 = vset.pattern.permute.xlu0 %v177_v0  ;;  %106 = vset.pattern.permute.xlu1 %v178_v1  ;;  %v179_v3 = vmov 2   ;;  %v180_v4 = vmov 0   ;;  %v37_v5 = vld [vmem:[#allocation2] sm:$0x3]  ;;  %s181_s0 = smov 32   ;;  %s182_s1 = smov 96  }
  0x1b   :  { %45 = vperm.xlu0 %104, %v36_v2   ;;  %55 = vperm.xlu1 %106, %v36_v2   ;;  %s183_s19 = smov 64   ;;  %vm71_vm0 = vcmask 261120   ;;  %vm73_vm1 = vcmask 523264   ;;  %s184_s20 = smov [#allocation7]   ;;  %vm75_vm2 = vcmask 785408  }
  0x1c   :  { %s84_s21 = sshll.u32 %s184_s20, 4  ;;  %s85_s21 = int_to_ptr.vmem [resolvable:$true] %s84_s21 }
  0x1d   :  { %s149_s22 = scalar_lea.vmem %s85_s21, 32  ;;  %p154_p11 = scmp.lt.s32.totalorder %s85_s21, %s85_s21 }
  0x1e   :  { %p150_p10 = scmp.ne.s32.totalorder %s85_s21, %s149_s22  ;;  %p155_p12 = scmp.lt.s32.totalorder %s149_s22, %s149_s22 }
  0x1f   :  { %105 = vset.pattern.permute.xlu0 %v179_v3  ;;  %107 = vset.pattern.permute.xlu1 %v180_v4 }
  0x20   :  { %50 = vperm.xlu0 %105, %v36_v2   ;;  %40 = vperm.xlu1 %107, %v36_v2   ;;  %p156_p13 = por %p155_p12, %p154_p11 }
  0x22   :  { %p157_p0 = pnand %p156_p13, %p150_p10 }
  0x24   :  { %108 = vset.pattern.permute.xlu0 %v178_v1 }
  0x96   :  { %v46_v6 = vpop.permute.xlu0 %45  ;;  %v56_v7 = vpop.permute.xlu1 %55 }
  0x97   :  { %v48_v8 = vmul.f32 %v46_v6, %v37_v5  ;;  %v58_v9 = vmul.f32 %v56_v7, %v37_v5 }
  0x99   :  { %60 = vrot.lane.b32.xlu1 %v48_v8, %s181_s0 }
  0x9b   :  { %v51_v10 = vpop.permute.xlu0 %50  ;;  %v41_v12 = vpop.permute.xlu1 %40 }
  0x9c   :  { %v53_v11 = vmul.f32 %v51_v10, %v37_v5  ;;  %v43_v14 = vmul.f32 %v41_v12, %v37_v5 }
  0x9d   :  { %68 = vrot.lane.b32.xlu1 %v58_v9, %s182_s1 }
  0x9e   :  { %64 = vrot.lane.b32.xlu0 %v53_v11, %s183_s19 }
 0x10b   :  { %v61_v13 = vpop.permute.xlu1 %60 }
 0x10c   :  { %v72_v16 = vsel %vm71_vm0, %v43_v14, %v61_v13 }
 0x10f   :  { %v69_v15 = vpop.permute.xlu1 %68 }
 0x110   :  { %v65_v17 = vpop.permute.xlu0 %64 }
 0x111   :  { %v74_v18 = vsel %vm73_vm1, %v72_v16, %v65_v17 }
 0x112   :  { %v76_v19 = vsel %vm75_vm2, %v74_v18, %v69_v15 }
 0x113   :  { %77 = vst [vmem:[#allocation7] sm:$0x3] %v76_v19 }
 0x114   :  { %160 = shalt.err (!%p157_p0)
}
 0x115   :  { %87 = dma.vmem_to_hbm [thread:$0]  %s85_s21, 32, %s211_s2, [#allocation4]  }
 0x116   :  { %173 = dma.done.wait [#allocation4], 32  }
 0x117   :  { %174 = vsyncadd [#allocation4], 4294967264 }
 0x118   :  { %91 = vsyncpa [#allocation3], 1 }
 0x119   :  { %92 = vsyncpa [#allocation6], 1 }
 0x11a   :  { %93 = vsyncpa [#allocation4], 1 }

</bundles_post_ra>
